<compile_context>
chip_gen: v7x
topology: tpu7x:2x2x1
jax: 0.10.0
libtpu: 0.0.40
codegen_flags: <defaults>
</compile_context>

<pallas_src>
import functools

import jax
import jax.numpy as jnp
from jax import lax
from jax.experimental import pallas as pl
from jax.experimental.pallas import tpu as pltpu


def _round_up(x: int, m: int) -> int:
    return ((x + m - 1) // m) * m


def _bigram_kernel(ids_ref, meta_ref,        # scalar prefetch (SMEM)
                   tgt_ref, emb_ref,         # VMEM inputs
                   logits_ref, loss_ref,     # outputs: (TN,V) VMEM, (1,1) SMEM
                   loss_acc,                 # SMEM scratch (1,) f32
                   *, tile_rows: int):
    i = pl.program_id(0)
    last = pl.num_programs(0) - 1
    V = emb_ref.shape[1]

    n_valid = meta_ref[0]          # true number of rows (B*T)
    has_targets = meta_ref[1]      # 1 if targets were supplied, else 0

    @pl.when(i == 0)
    def _init():
        loss_acc[0] = jnp.float32(0.0)
        loss_ref[0, 0] = jnp.float32(0.0)

    base = i * tile_rows

    # --- Embedding lookup: scalar-indexed row gather from the resident table.
    #     ids come from SMEM; each row is a (1, V) dynamic-sublane copy.
    def gather_row(r, carry):
        tok = jnp.clip(ids_ref[base + r], 0, V - 1)          # clamp OOB ids
        logits_ref[pl.ds(r, 1), :] = emb_ref[pl.ds(tok, 1), :]
        return carry

    unroll = tile_rows if tile_rows <= 32 else 8
    lax.fori_loop(0, tile_rows, gather_row, 0, unroll=unroll)

    # --- Cross-entropy (sum of per-row NLL), only when targets are present.
    @pl.when(has_targets == 1)
    def _ce():
        logits = logits_ref[...]                                   # (TN, V) f32
        tgt = tgt_ref[...]                                         # (TN, 1) i32
        col = lax.broadcasted_iota(jnp.int32, logits.shape, 1)
        m = jnp.max(logits, axis=-1, keepdims=True)
        lse = m + jnp.log(jnp.sum(jnp.exp(logits - m), axis=-1, keepdims=True))
        tgt_logit = jnp.sum(jnp.where(col == tgt, logits, 0.0),
                            axis=-1, keepdims=True)                # (TN, 1)
        row = base + lax.broadcasted_iota(jnp.int32, (tile_rows, 1), 0)
        valid = (row < n_valid).astype(jnp.float32)                # mask padding
        loss_acc[0] = loss_acc[0] + jnp.sum((lse - tgt_logit) * valid)

    @pl.when((i == last) & (has_targets == 1))
    def _finalize():
        loss_ref[0, 0] = loss_acc[0] / n_valid.astype(jnp.float32)


def bigram_forward(emb_table, inputs, targets=None, tile_rows=None):
    """Mirrors BigramLanguageModel.forward.

    Returns (logits, loss):
      - targets is None : logits shape (B, T, V), loss is None
      - targets given   : logits shape (B*T, V),  loss is a scalar (f32)
    """
    B, T = inputs.shape
    V = emb_table.shape[0]
    N = B * T

    if tile_rows is None:
        tile_rows = min(128, _round_up(N, 8))
    tile_rows = max(8, _round_up(tile_rows, 8))
    n_pad = _round_up(N, tile_rows)
    num_tiles = n_pad // tile_rows

    ids = jnp.zeros((n_pad,), jnp.int32).at[:N].set(
        inputs.reshape(-1).astype(jnp.int32))
    if targets is not None:
        tgt = jnp.zeros((n_pad,), jnp.int32).at[:N].set(
            targets.reshape(-1).astype(jnp.int32))
        has_t = 1
    else:
        tgt = jnp.zeros((n_pad,), jnp.int32)
        has_t = 0
    meta = jnp.array([N, has_t], jnp.int32)
    tgt_col = tgt.reshape(n_pad, 1)
    emb_table = emb_table.astype(jnp.float32)

    kernel = functools.partial(_bigram_kernel, tile_rows=tile_rows)

    logits_pad, loss = pl.pallas_call(
        kernel,
        out_shape=(
            jax.ShapeDtypeStruct((n_pad, V), jnp.float32),
            jax.ShapeDtypeStruct((1, 1), jnp.float32),
        ),
        grid_spec=pltpu.PrefetchScalarGridSpec(
            num_scalar_prefetch=2,                 # ids, meta  -> SMEM
            grid=(num_tiles,),
            in_specs=[
                # targets column, tiled over rows (only used when has_targets)
                pl.BlockSpec((tile_rows, 1), lambda i, ids_s, meta_s: (i, 0)),
                # embedding table: resident in VMEM across the whole grid
                pl.BlockSpec((V, V), lambda i, ids_s, meta_s: (0, 0)),
            ],
            out_specs=(
                # lane-dense (TN, V) logits tile per grid step
                pl.BlockSpec((tile_rows, V), lambda i, ids_s, meta_s: (i, 0)),
                # scalar loss, resident SMEM block written at finalize
                pl.BlockSpec((1, 1), lambda i, ids_s, meta_s: (0, 0),
                             memory_space=pltpu.MemorySpace.SMEM),
            ),
            scratch_shapes=[pltpu.SMEM((1,), jnp.float32)],
        ),
        compiler_params=pltpu.CompilerParams(
            # reduction/accumulator lives across the row axis -> arbitrary
            dimension_semantics=("arbitrary",),
        ),
    )(ids, meta, tgt_col, emb_table)

    logits = logits_pad[:N]
    if targets is None:
        return logits.reshape(B, T, V), None
    return logits, loss[0, 0]


if __name__ == "__main__":
    VOCAB = 128   # vocab_size (embedding is (vocab, vocab))
    B, T = 2, 8

    key = jax.random.PRNGKey(0)
    k_emb, k_in, k_tgt = jax.random.split(key, 3)

    emb_table = 0.02 * jax.random.normal(k_emb, (VOCAB, VOCAB), dtype=jnp.float32)
    inputs = jax.random.randint(k_in, (B, T), 0, VOCAB, dtype=jnp.int32)
    targets = jax.random.randint(k_tgt, (B, T), 0, VOCAB, dtype=jnp.int32)

    # Pallas kernel forward (with targets -> logits (B*T, V) + scalar loss).
    # tile_rows=8 so the toy problem exercises a multi-step grid (2 tiles).
    logits, loss = bigram_forward(emb_table, inputs, targets, tile_rows=8)
    jax.block_until_ready((logits, loss))

    # Also exercise the targets=None branch (logits only, shape (B, T, V)).
    logits_nl, loss_nl = bigram_forward(emb_table, inputs, None, tile_rows=8)
    jax.block_until_ready(logits_nl)

    # Pure-JAX reference check.
    ref_logits = emb_table[inputs.reshape(-1)]                       # (B*T, V)
    ref_lse = jax.nn.logsumexp(ref_logits, axis=-1)
    ref_tgt = ref_logits[jnp.arange(B * T), targets.reshape(-1)]
    ref_loss = jnp.mean(ref_lse - ref_tgt)

    assert logits.shape == (B * T, VOCAB)
    assert logits_nl.shape == (B, T, VOCAB) and loss_nl is None
    assert jnp.allclose(logits, ref_logits, atol=1e-5)
    assert jnp.allclose(logits_nl.reshape(B * T, VOCAB), ref_logits, atol=1e-5)
    assert jnp.allclose(loss, ref_loss, atol=1e-5)

    print("KERNEL_OK")
</pallas_src>

<mosaic_0001>
module attributes {stable_mosaic.version = 11 : i64} {
  func.func @_bigram_kernel(%arg0: i32, %arg1: memref<16xi32, #tpu.memory_space<smem>>, %arg2: memref<2xi32, #tpu.memory_space<smem>>, %arg3: memref<8x1xi32, #tpu.memory_space<vmem>>, %arg4: memref<128x128xf32, #tpu.memory_space<vmem>>, %arg5: memref<8x128xf32, #tpu.memory_space<vmem>>, %arg6: memref<1x1xf32, #tpu.memory_space<smem>>, %arg7: memref<1xf32, #tpu.memory_space<smem>>) attributes {dimension_semantics = [#tpu.dimension_semantics<arbitrary>], iteration_bounds = array<i64: 2>, scalar_prefetch = 2 : i64, scratch_operands = 1 : i64, tpu.core_type = #tpu.core_type<tc>, window_params = [{transform_indices = @transform_0, window_bounds = array<i64: 8, 1>}, {pipeline_mode = #tpu.pipeline_mode<synchronous>, transform_indices = @transform_1, window_bounds = array<i64: 128, 128>}, {transform_indices = @transform_2, window_bounds = array<i64: 8, 128>}, {transform_indices = @transform_3, window_bounds = array<i64: 1, 1>}]} {
    %c0 = arith.constant 0 : index
    %0 = memref.load %arg2[%c0] : memref<2xi32, #tpu.memory_space<smem>>
    %c1 = arith.constant 1 : index
    %1 = memref.load %arg2[%c1] : memref<2xi32, #tpu.memory_space<smem>>
    %c0_i32 = arith.constant 0 : i32
    %2 = arith.cmpi eq, %arg0, %c0_i32 : i32
    %3 = arith.extui %2 : i1 to i32
    %c0_i32_0 = arith.constant 0 : i32
    %4 = arith.cmpi ne, %3, %c0_i32_0 : i32
    scf.if %4 {
      %cst = arith.constant 0.000000e+00 : f32
      %c0_39 = arith.constant 0 : index
      %86 = memref.load %arg7[%c0_39] : memref<1xf32, #tpu.memory_space<smem>>
      memref.store %cst, %arg7[%c0_39] : memref<1xf32, #tpu.memory_space<smem>>
      %cst_40 = arith.constant 0.000000e+00 : f32
      %c0_41 = arith.constant 0 : index
      %c0_42 = arith.constant 0 : index
      %87 = memref.load %arg6[%c0_41, %c0_42] : memref<1x1xf32, #tpu.memory_space<smem>>
      memref.store %cst_40, %arg6[%c0_41, %c0_42] : memref<1x1xf32, #tpu.memory_space<smem>>
    } else {
    }
    %c8_i32 = arith.constant 8 : i32
    %5 = arith.muli %arg0, %c8_i32 : i32
    %c0_i32_1 = arith.constant 0 : i32
    %6 = arith.addi %5, %c0_i32_1 : i32
    %7 = arith.index_cast %6 : i32 to index
    %8 = memref.load %arg1[%7] : memref<16xi32, #tpu.memory_space<smem>>
    %c0_i32_2 = arith.constant 0 : i32
    %c127_i32 = arith.constant 127 : i32
    %9 = arith.maxsi %c0_i32_2, %8 : i32
    %10 = arith.minsi %c127_i32, %9 : i32
    %11 = arith.index_cast %10 : i32 to index
    %c0_3 = arith.constant 0 : index
    %12 = vector.load %arg4[%11, %c0_3] : memref<128x128xf32, #tpu.memory_space<vmem>>, vector<1x128xf32>
    %13 = arith.index_cast %c0_i32_1 : i32 to index
    %c0_4 = arith.constant 0 : index
    %14 = vector.load %arg5[%13, %c0_4] : memref<8x128xf32, #tpu.memory_space<vmem>>, vector<1x128xf32>
    tpu.vector_store %arg5[%13, %c0_4], %12 {strides = array<i32>} : memref<8x128xf32, #tpu.memory_space<vmem>>, vector<1x128xf32>,
    %c1_i32 = arith.constant 1 : i32
    %15 = arith.addi %5, %c1_i32 : i32
    %16 = arith.index_cast %15 : i32 to index
    %17 = memref.load %arg1[%16] : memref<16xi32, #tpu.memory_space<smem>>
    %c0_i32_5 = arith.constant 0 : i32
    %c127_i32_6 = arith.constant 127 : i32
    %18 = arith.maxsi %c0_i32_5, %17 : i32
    %19 = arith.minsi %c127_i32_6, %18 : i32
    %20 = arith.index_cast %19 : i32 to index
    %c0_7 = arith.constant 0 : index
    %21 = vector.load %arg4[%20, %c0_7] : memref<128x128xf32, #tpu.memory_space<vmem>>, vector<1x128xf32>
    %22 = arith.index_cast %c1_i32 : i32 to index
    %c0_8 = arith.constant 0 : index
    %23 = vector.load %arg5[%22, %c0_8] : memref<8x128xf32, #tpu.memory_space<vmem>>, vector<1x128xf32>
    tpu.vector_store %arg5[%22, %c0_8], %21 {strides = array<i32>} : memref<8x128xf32, #tpu.memory_space<vmem>>, vector<1x128xf32>,
    %c2_i32 = arith.constant 2 : i32
    %24 = arith.addi %5, %c2_i32 : i32
    %25 = arith.index_cast %24 : i32 to index
    %26 = memref.load %arg1[%25] : memref<16xi32, #tpu.memory_space<smem>>
    %c0_i32_9 = arith.constant 0 : i32
    %c127_i32_10 = arith.constant 127 : i32
    %27 = arith.maxsi %c0_i32_9, %26 : i32
    %28 = arith.minsi %c127_i32_10, %27 : i32
    %29 = arith.index_cast %28 : i32 to index
    %c0_11 = arith.constant 0 : index
    %30 = vector.load %arg4[%29, %c0_11] : memref<128x128xf32, #tpu.memory_space<vmem>>, vector<1x128xf32>
    %31 = arith.index_cast %c2_i32 : i32 to index
    %c0_12 = arith.constant 0 : index
    %32 = vector.load %arg5[%31, %c0_12] : memref<8x128xf32, #tpu.memory_space<vmem>>, vector<1x128xf32>
    tpu.vector_store %arg5[%31, %c0_12], %30 {strides = array<i32>} : memref<8x128xf32, #tpu.memory_space<vmem>>, vector<1x128xf32>,
    %c3_i32 = arith.constant 3 : i32
    %33 = arith.addi %5, %c3_i32 : i32
    %34 = arith.index_cast %33 : i32 to index
    %35 = memref.load %arg1[%34] : memref<16xi32, #tpu.memory_space<smem>>
    %c0_i32_13 = arith.constant 0 : i32
    %c127_i32_14 = arith.constant 127 : i32
    %36 = arith.maxsi %c0_i32_13, %35 : i32
    %37 = arith.minsi %c127_i32_14, %36 : i32
    %38 = arith.index_cast %37 : i32 to index
    %c0_15 = arith.constant 0 : index
    %39 = vector.load %arg4[%38, %c0_15] : memref<128x128xf32, #tpu.memory_space<vmem>>, vector<1x128xf32>
    %40 = arith.index_cast %c3_i32 : i32 to index
    %c0_16 = arith.constant 0 : index
    %41 = vector.load %arg5[%40, %c0_16] : memref<8x128xf32, #tpu.memory_space<vmem>>, vector<1x128xf32>
    tpu.vector_store %arg5[%40, %c0_16], %39 {strides = array<i32>} : memref<8x128xf32, #tpu.memory_space<vmem>>, vector<1x128xf32>,
    %c4_i32 = arith.constant 4 : i32
    %42 = arith.addi %5, %c4_i32 : i32
    %43 = arith.index_cast %42 : i32 to index
    %44 = memref.load %arg1[%43] : memref<16xi32, #tpu.memory_space<smem>>
    %c0_i32_17 = arith.constant 0 : i32
    %c127_i32_18 = arith.constant 127 : i32
    %45 = arith.maxsi %c0_i32_17, %44 : i32
    %46 = arith.minsi %c127_i32_18, %45 : i32
    %47 = arith.index_cast %46 : i32 to index
    %c0_19 = arith.constant 0 : index
    %48 = vector.load %arg4[%47, %c0_19] : memref<128x128xf32, #tpu.memory_space<vmem>>, vector<1x128xf32>
    %49 = arith.index_cast %c4_i32 : i32 to index
    %c0_20 = arith.constant 0 : index
    %50 = vector.load %arg5[%49, %c0_20] : memref<8x128xf32, #tpu.memory_space<vmem>>, vector<1x128xf32>
    tpu.vector_store %arg5[%49, %c0_20], %48 {strides = array<i32>} : memref<8x128xf32, #tpu.memory_space<vmem>>, vector<1x128xf32>,
    %c5_i32 = arith.constant 5 : i32
    %51 = arith.addi %5, %c5_i32 : i32
    %52 = arith.index_cast %51 : i32 to index
    %53 = memref.load %arg1[%52] : memref<16xi32, #tpu.memory_space<smem>>
    %c0_i32_21 = arith.constant 0 : i32
    %c127_i32_22 = arith.constant 127 : i32
    %54 = arith.maxsi %c0_i32_21, %53 : i32
    %55 = arith.minsi %c127_i32_22, %54 : i32
    %56 = arith.index_cast %55 : i32 to index
    %c0_23 = arith.constant 0 : index
    %57 = vector.load %arg4[%56, %c0_23] : memref<128x128xf32, #tpu.memory_space<vmem>>, vector<1x128xf32>
    %58 = arith.index_cast %c5_i32 : i32 to index
    %c0_24 = arith.constant 0 : index
    %59 = vector.load %arg5[%58, %c0_24] : memref<8x128xf32, #tpu.memory_space<vmem>>, vector<1x128xf32>
    tpu.vector_store %arg5[%58, %c0_24], %57 {strides = array<i32>} : memref<8x128xf32, #tpu.memory_space<vmem>>, vector<1x128xf32>,
    %c6_i32 = arith.constant 6 : i32
    %60 = arith.addi %5, %c6_i32 : i32
    %61 = arith.index_cast %60 : i32 to index
    %62 = memref.load %arg1[%61] : memref<16xi32, #tpu.memory_space<smem>>
    %c0_i32_25 = arith.constant 0 : i32
    %c127_i32_26 = arith.constant 127 : i32
    %63 = arith.maxsi %c0_i32_25, %62 : i32
    %64 = arith.minsi %c127_i32_26, %63 : i32
    %65 = arith.index_cast %64 : i32 to index
    %c0_27 = arith.constant 0 : index
    %66 = vector.load %arg4[%65, %c0_27] : memref<128x128xf32, #tpu.memory_space<vmem>>, vector<1x128xf32>
    %67 = arith.index_cast %c6_i32 : i32 to index
    %c0_28 = arith.constant 0 : index
    %68 = vector.load %arg5[%67, %c0_28] : memref<8x128xf32, #tpu.memory_space<vmem>>, vector<1x128xf32>
    tpu.vector_store %arg5[%67, %c0_28], %66 {strides = array<i32>} : memref<8x128xf32, #tpu.memory_space<vmem>>, vector<1x128xf32>,
    %c7_i32 = arith.constant 7 : i32
    %69 = arith.addi %5, %c7_i32 : i32
    %70 = arith.index_cast %69 : i32 to index
    %71 = memref.load %arg1[%70] : memref<16xi32, #tpu.memory_space<smem>>
    %c0_i32_29 = arith.constant 0 : i32
    %c127_i32_30 = arith.constant 127 : i32
    %72 = arith.maxsi %c0_i32_29, %71 : i32
    %73 = arith.minsi %c127_i32_30, %72 : i32
    %74 = arith.index_cast %73 : i32 to index
    %c0_31 = arith.constant 0 : index
    %75 = vector.load %arg4[%74, %c0_31] : memref<128x128xf32, #tpu.memory_space<vmem>>, vector<1x128xf32>
    %76 = arith.index_cast %c7_i32 : i32 to index
    %c0_32 = arith.constant 0 : index
    %77 = vector.load %arg5[%76, %c0_32] : memref<8x128xf32, #tpu.memory_space<vmem>>, vector<1x128xf32>
    tpu.vector_store %arg5[%76, %c0_32], %75 {strides = array<i32>} : memref<8x128xf32, #tpu.memory_space<vmem>>, vector<1x128xf32>,
    %c8_i32_33 = arith.constant 8 : i32
    %c1_i32_34 = arith.constant 1 : i32
    %78 = arith.cmpi eq, %1, %c1_i32_34 : i32
    %79 = arith.extui %78 : i1 to i32
    %c0_i32_35 = arith.constant 0 : i32
    %80 = arith.cmpi ne, %79, %c0_i32_35 : i32
    scf.if %80 {
      %c0_39 = arith.constant 0 : index
      %c0_40 = arith.constant 0 : index
      %86 = vector.load %arg5[%c0_39, %c0_40] : memref<8x128xf32, #tpu.memory_space<vmem>>, vector<8x128xf32>
      %c0_41 = arith.constant 0 : index
      %c0_42 = arith.constant 0 : index
      %87 = vector.load %arg3[%c0_41, %c0_42] : memref<8x1xi32, #tpu.memory_space<vmem>>, vector<8x1xi32>
      %88 = tpu.iota {dimensions = array<i32: 1>} : vector<8x128xi32>
      %cst = arith.constant dense<0xFF800000> : vector<8xf32>
      %89 = vector.multi_reduction <maximumf>, %86, %cst [1] : vector<8x128xf32> to vector<8xf32>
      %90 = vector.shape_cast %89 : vector<8xf32> to vector<8x1xf32>
      %91 = vector.broadcast %90 : vector<8x1xf32> to vector<8x128xf32>
      %92 = arith.subf %86, %91 : vector<8x128xf32>
      %93 = math.exp %92 : vector<8x128xf32>
      %cst_43 = arith.constant dense<0.000000e+00> : vector<8xf32>
      %94 = vector.multi_reduction <add>, %93, %cst_43 [1] : vector<8x128xf32> to vector<8xf32>
      %95 = vector.shape_cast %94 : vector<8xf32> to vector<8x1xf32>
      %96 = math.log %95 : vector<8x1xf32>
      %97 = arith.addf %90, %96 : vector<8x1xf32>
      %98 = vector.broadcast %87 : vector<8x1xi32> to vector<8x128xi32>
      %99 = arith.cmpi eq, %88, %98 : vector<8x128xi32>
      %cst_44 = arith.constant 0.000000e+00 : f32
      %100 = vector.broadcast %cst_44 : f32 to vector<8x128xf32>
      %101 = arith.select %99, %86, %100 : vector<8x128xi1>, vector<8x128xf32>
      %cst_45 = arith.constant dense<0.000000e+00> : vector<8xf32>
      %102 = vector.multi_reduction <add>, %101, %cst_45 [1] : vector<8x128xf32> to vector<8xf32>
      %103 = vector.shape_cast %102 : vector<8xf32> to vector<8x1xf32>
      %104 = tpu.iota {dimensions = array<i32: 0>} : vector<8x1xi32>
      %105 = vector.broadcast %5 : i32 to vector<8x1xi32>
      %106 = arith.addi %105, %104 : vector<8x1xi32>
      %107 = vector.broadcast %0 : i32 to vector<8x1xi32>
      %108 = arith.cmpi slt, %106, %107 : vector<8x1xi32>
      %109 = arith.extui %108 : vector<8x1xi1> to vector<8x1xi32>
      %110 = arith.sitofp %109 : vector<8x1xi32> to vector<8x1xf32>
      %c0_46 = arith.constant 0 : index
      %111 = memref.load %arg7[%c0_46] : memref<1xf32, #tpu.memory_space<smem>>
      %112 = arith.subf %97, %103 : vector<8x1xf32>
      %113 = arith.mulf %112, %110 : vector<8x1xf32>
      %114 = vector.shape_cast %113 : vector<8x1xf32> to vector<1x8x1xf32>
      %cst_47 = arith.constant dense<0.000000e+00> : vector<1xf32>
      %115 = vector.multi_reduction <add>, %114, %cst_47 [1, 2] : vector<1x8x1xf32> to vector<1xf32>
      %116 = vector.shape_cast %115 : vector<1xf32> to vector<1x1x1xf32>
      %117 = vector.extract %116[0, 0, 0] : f32 from vector<1x1x1xf32>
      %118 = arith.addf %111, %117 : f32
      %c0_48 = arith.constant 0 : index
      %119 = memref.load %arg7[%c0_48] : memref<1xf32, #tpu.memory_space<smem>>
      memref.store %118, %arg7[%c0_48] : memref<1xf32, #tpu.memory_space<smem>>
    } else {
    }
    %c1_i32_36 = arith.constant 1 : i32
    %81 = arith.cmpi eq, %arg0, %c1_i32_36 : i32
    %c1_i32_37 = arith.constant 1 : i32
    %82 = arith.cmpi eq, %1, %c1_i32_37 : i32
    %83 = arith.andi %81, %82 : i1
    %84 = arith.extui %83 : i1 to i32
    %c0_i32_38 = arith.constant 0 : i32
    %85 = arith.cmpi ne, %84, %c0_i32_38 : i32
    scf.if %85 {
      %c0_39 = arith.constant 0 : index
      %86 = memref.load %arg7[%c0_39] : memref<1xf32, #tpu.memory_space<smem>>
      %87 = arith.sitofp %0 : i32 to f32
      %88 = arith.divf %86, %87 : f32
      %c0_40 = arith.constant 0 : index
      %c0_41 = arith.constant 0 : index
      %89 = memref.load %arg6[%c0_40, %c0_41] : memref<1x1xf32, #tpu.memory_space<smem>>
      memref.store %88, %arg6[%c0_40, %c0_41] : memref<1x1xf32, #tpu.memory_space<smem>>
    } else {
    }
    return
  }
  func.func @transform_0(%arg0: i32, %arg1: memref<16xi32, #tpu.memory_space<smem>>, %arg2: memref<2xi32, #tpu.memory_space<smem>>) -> (i32, i32) {
    %c0_i32 = arith.constant 0 : i32
    %c0_i32_0 = arith.constant 0 : i32
    return %arg0, %c0_i32 : i32, i32
  }
  func.func @transform_1(%arg0: i32, %arg1: memref<16xi32, #tpu.memory_space<smem>>, %arg2: memref<2xi32, #tpu.memory_space<smem>>) -> (i32, i32) {
    %c0_i32 = arith.constant 0 : i32
    %c0_i32_0 = arith.constant 0 : i32
    %c0_i32_1 = arith.constant 0 : i32
    return %c0_i32, %c0_i32_0 : i32, i32
  }
  func.func @transform_2(%arg0: i32, %arg1: memref<16xi32, #tpu.memory_space<smem>>, %arg2: memref<2xi32, #tpu.memory_space<smem>>) -> (i32, i32) {
    %c0_i32 = arith.constant 0 : i32
    %c0_i32_0 = arith.constant 0 : i32
    return %arg0, %c0_i32 : i32, i32
  }
  func.func @transform_3(%arg0: i32, %arg1: memref<16xi32, #tpu.memory_space<smem>>, %arg2: memref<2xi32, #tpu.memory_space<smem>>) -> (i32, i32) {
    %c0_i32 = arith.constant 0 : i32
    %c0_i32_0 = arith.constant 0 : i32
    %c0_i32_1 = arith.constant 0 : i32
    return %c0_i32, %c0_i32_0 : i32, i32
  }
}

</mosaic_0001>

<bundles_post_ra>
// kernel: tpu_custom_call.1
= control target key start
LH: loop header
LB: loop body
LE: loop exit
PB: predicated region body
PF: predicated region fallthrough
CT: control target
= control target key end

     0   :  { %s994_s0 = inlined_call_operand.vmem [shape: s32[16], index: 0, kind: input, shape index: {}]   ;;  %s995_s2 = inlined_call_operand.vmem [shape: s32[16,1], index: 2, kind: input, shape index: {}]   ;;  %s996_s3 = inlined_call_operand.hbm [shape: f32[128,128], index: 3, kind: input, shape index: {}]   ;;  %s997_s4 = inlined_call_operand.hbm [shape: f32[16,128], index: 4, kind: output, shape index: {0}]   ;;  %s998_s5 = inlined_call_operand.hbm [shape: f32[1,1], index: 5, kind: output, shape index: {1}]   ;;  %s999_s1 = inlined_call_operand.vmem [shape: s32[2], index: 1, kind: input, shape index: {}]  }
   0x1   :  { %s11_s20 = sshll.u32 %s994_s0, 4  ;;  %s15_s23 = sshll.u32 %s999_s1, 4  ;;  %s12_s20 = int_to_ptr.vmem [resolvable:$true] %s11_s20  ;;  %s16_s23 = int_to_ptr.vmem [resolvable:$true] %s15_s23 }
   0x2   :  { %s607_s24 = scalar_lea.vmem %s12_s20, 16  ;;  %p612_p1 = scmp.lt.s32.totalorder %s12_s20, %s12_s20 }
   0x3   :  { %p608_p0 = scmp.ne.s32.totalorder %s12_s20, %s607_s24  ;;  %p613_p2 = scmp.lt.s32.totalorder %s607_s24, %s607_s24 }
   0x5   :  { %p614_p3 = por %p613_p2, %p612_p1 }
   0x7   :  { %p615_p4 = pnand %p614_p3, %p608_p0 }
   0x9   :  { %618 = shalt.err (!%p615_p4)  }
   0xa   :  { %s745_s25 = smov [#allocation4]   ;;  %s619_s26 = scalar_lea.vmem %s16_s23, 16 }
   0xb   :  { %14 = dma.vmem_to_smem %s12_s20, 16, %s745_s25, [#allocation3] }
   0xc   :  { %p620_p5 = scmp.ne.s32.totalorder %s16_s23, %s619_s26  ;;  %p624_p6 = scmp.lt.s32.totalorder %s16_s23, %s16_s23 }
   0xd   :  { %p625_p7 = scmp.lt.s32.totalorder %s619_s26, %s619_s26 }
   0xf   :  { %p626_p8 = por %p625_p7, %p624_p6 }
  0x11   :  { %p627_p9 = pnand %p626_p8, %p620_p5 }
  0x13   :  { %630 = shalt.err (!%p627_p9)  }
  0x14   :  { %s746_s0 = smov [#allocation5]  }
  0x15   :  { %18 = dma.vmem_to_smem %s16_s23, 16, %s746_s0, [#allocation3] }
  0x16   :  { %715 = dma.done.wait [#allocation3], 32 }
  0x17   :  { %716 = vsyncadd [#allocation3], 4294967264 }
  0x18   :  { %20 = sfence }
  0x19   :  { %21 = vsyncpa [#allocation7], 0 }
  0x1a   :  { %22 = vsyncpa [#allocation8], 0 }
  0x1b   :  { %24 = vsyncpa [#allocation8 + $0x1], 0 }
  0x1c   :  { %25 = vsyncpa [#allocation9], 0  ;;  %s791_s1 = smov 0   ;;  %s793_s27 = smov 0  }
  0x1d   :  { %s795_s28 = smov 0   ;;  %s797_s29 = smov 0  }
  0x1e LB: > { %s812_s30 = sadd.s32 4294967295, %s743_s29   ;;  %s453_s6 = sadd.s32 4294967294, %s743_s29   ;;  %s743_s29 = sphi %s797_s29, %s1025_s29   ;;  %s739_s28 = sphi %s795_s28, %s1024_s28   ;;  %s735_s27 = sphi %s793_s27, %s1023_s27   ;;  %s731_s1 = sphi %s791_s1, %s1022_s1  }
  0x1f   : > { %s816_s7 = sadd.s32 1, %s743_s29   ;;  %s85_s8 = sadd.s32 1, %s739_s28 }
  0x20   : > { %s82_s9 = ssub.s32 %s743_s29, %s816_s7  ;;  %p95_p10 = scmp.ne.s32.totalorder %s739_s28, %s735_s27 }
  0x21   : > { %p83_p11 = scmp.eq.s32.totalorder %s82_s9, 0  ;;  %p1000_p12 = scmp.eq.s32.totalorder %s812_s30, 1 }
  0x22   : > { %p101_p13 = scmp.ne.s32.totalorder %s735_s27, %s731_s1  ;;  %p102_p0 = scmp.eq.s32.totalorder %s453_s6, 1 }
  0x23   : > { %s827_s10 = scalar_select %p83_p11, %s739_s28, %s85_s8  }
  0x24   : > { %p831_p1 = por %p1000_p12, %p95_p10  ;;  %p835_p2 = por %p102_p0, %p101_p13 }
  0x25   : > { %p454_p3 = scmp.ge.s32.totalorder %s743_s29, 1  ;;  %p130_p4 = scmp.lt.s32.totalorder %s743_s29, 3 }
  0x26   : > { %s1005_s11 = scalar_select %p831_p1, 1, 0 }
  0x27   : > { %s1006_s12 = scalar_select %p835_p2, 1, 0 }
  0x28   : > { %p1001_p5 = scmp.eq.s32.totalorder %s812_s30, 0  ;;  %p842_p6 = pnand %p454_p3, %p130_p4 }
  0x29   : > { %s747_s14 = smov [#allocation6]   ;;  %s631_s19 = scalar_lea.hbm %s996_s3, 2048 }
  0x2a   : > { %s1007_s13 = scalar_select %p842_p6, 1, 0 }
  0x2b   : > { %s142_s15 = sshll.u32 %s747_s14, 4  ;;  %p545_p7 = pneg %p842_p6  ;;  %s143_s15 = int_to_ptr.vmem [resolvable:$true] %s142_s15 }
  0x2c   : > { %p632_p9 = scmp.ne.s32.totalorder %s996_s3, %s631_s19  ;;  %p638_p0 = scmp.lt.u32.totalorder %s631_s19, %s996_s3 }
  0x2d   : > { %p850_p8 = pnand %p1001_p5, %p545_p7 }
  0x2f   : > { %p633_p10 = pneg %p850_p8 }
  0x31   : > { %p634_p11 = pnand %p633_p10, %p632_p9 }
  0x33   : > { %p635_p13 = pneg %p634_p11 }
  0x35   : > { %p640_p3 = pnand %p638_p0, %p635_p13 }
  0x37   : > { %643 = shalt.err (!%p640_p3)
}
  0x38   : > { %s644_s24 = scalar_lea.vmem %s143_s15, 2048  ;;  %p652_p5 = scmp.lt.s32.totalorder %s143_s15, %s143_s15 }
  0x39   : > { %p645_p4 = scmp.ne.s32.totalorder %s143_s15, %s644_s24  ;;  %p653_p2 = scmp.lt.s32.totalorder %s644_s24, %s644_s24 }
  0x3b   : > { %p647_p7 = pnand %p645_p4, %p633_p10  ;;  %p654_p1 = por %p653_p2, %p652_p5 }
  0x3d   : > { %p648_p12 = pneg %p647_p7 }
  0x3f   : > { %p655_p6 = pnand %p654_p1, %p648_p12 }
  0x41   : > { %658 = shalt.err (!%p655_p6)
}
  0x42   : > { %s748_s25 = smov 128   ;;  %s749_s26 = smov 8  }
  0x43   : > { %548 = dma.hbm_to_vmem [thread:$0]  (!%p850_p8), %s996_s3, 2048, %s143_s15, [#allocation7], %s748_s25, %s748_s25, %s749_s26  }
  0x44   : > { %p1009_p9 = scmp.ne.s32.totalorder %s1007_s13, 0 }
  0x45   : > { %p1010_p11 = scmp.eq.s32.totalorder (!%p1009_p9), %s812_s30, 0 }
  0x46   : > { %165 = sbr.rel (%p1009_p9) target bundleno = 769 (0x301), region = 28 }
  0x4d   : > { %718 = dma.done.wait (%p1010_p11), [#allocation7], 2048   ;;  %p1011_p10 = pmov %p1010_p11 }
  0x4e   : > { %s1004_s8 = sand.u32 1, %s735_s27   ;;  %s877_s9 = sld [smem:[#allocation5]] }
  0x4f   : > { %720 = vsyncadd (%p1011_p10), [#allocation7], 4294965248  ;;  %s879_s14 = sld [smem:[#allocation5 + $0x1]]  ;;  %s750_s13 = smov 0.0  }
  0x50   : > { %p1012_p12 = pmov %p1011_p10  ;;  %s459_s15 = sshll.u32 %s1004_s8, 3 }
  0x51   : > { %p1013_p1 = pmov %p1011_p10  ;;  %p188_p2 = scmp.lt.s32.totalorder %s812_s30, 1 }
  0x52   : > { %537 = sst [smem:[#allocation2]] (%p1012_p12), %s750_s13  ;;  %s889_s16 = sshll.u32 %s812_s30, 3 }
  0x53   : > { %538 = sst [smem:[#allocation11]] (%p1013_p1), %s750_s13  ;;  %s211_s18 = sadd.s32 1, %s889_s16 }
  0x54   : > { %s203_s17 = sld [smem:[#allocation4 + %s889_s16]]  ;;  %s220_s22 = sadd.s32 2, %s889_s16 }
  0x55   : > { %s189_s19 = scalar_select %p188_p2, %s812_s30, 1 }
  0x56   : > { %p274_p5 = scmp.eq.s32.totalorder %s879_s14, 1  ;;  %s212_s20 = sld [smem:[#allocation4 + %s211_s18]] }
  0x57   : > { %s460_s21 = sshll.u32 %s189_s19, 3  ;;  %s221_s26 = sld [smem:[#allocation4 + %s220_s22]] }
  0x58   : > { %s899_s25 = scalar_lea.vmem %s995_s2, %s460_s21  ;;  %s229_s0 = sadd.s32 3, %s889_s16 }
  0x59   : > { %s238_s6 = sadd.s32 4, %s889_s16  ;;  %s230_s13 = sld [smem:[#allocation4 + %s229_s0]] }
  0x5a   : > { %p204_p6 = scmp.gt.s32.totalorder %s203_s17, 0  ;;  %p464_p8 = scmp.lt.s32.totalorder %s203_s17, 127 }
  0x5b   : > { %s903_s8 = sld [smem:[#allocation4 + %s238_s6]]  ;;  %s905_s19 = scalar_lea.vmem [#allocation10], %s459_s15 }
  0x5c   : > { %s1027_s17 = smov (!%p204_p6, %s203_s17), 0  ;;  %p213_p13 = scmp.gt.s32.totalorder %s212_s20, 0 }
  0x5d   : > { %p469_p0 = scmp.lt.s32.totalorder %s212_s20, 127  ;;  %s1029_s17 = smov (!%p464_p8, %s1027_s17), 127 }
  0x5e   : > { %s1031_s20 = smov (!%p213_p13, %s212_s20), 0  ;;  %p222_p3 = scmp.gt.s32.totalorder %s221_s26, 0 }
  0x5f   : > { %s208_s18 = scalar_lea.vmem [#allocation6], %s1029_s17  ;;  %s1033_s20 = smov (!%p469_p0, %s1031_s20), 127 }
  0x60   : > { %v209_v0 = vld [vmem:[%s208_s18] sm:$0x1]  ;;  %s223_s21 = scalar_select %p222_p3, %s221_s26, 0 }
  0x61   : > { %210 = vst [vmem:[%s905_s19] sm:$0x1] %v209_v0  ;;  %p474_p4 = scmp.lt.s32.totalorder %s221_s26, 127  ;;  %s217_s22 = scalar_lea.vmem [#allocation6], %s1033_s20 }
  0x62   : > { %v218_v1 = vld [vmem:[%s217_s22] sm:$0x1]  ;;  %p231_p7 = scmp.gt.s32.totalorder %s230_s13, 0  ;;  %p479_p9 = scmp.lt.s32.totalorder %s230_s13, 127 }
  0x63   : > { %219 = vst [vmem:[%s905_s19 + $0x1] sm:$0x1] %v218_v1  ;;  %s1035_s21 = smov (!%p474_p4, %s223_s21), 127  ;;  %p240_p11 = scmp.gt.s32.totalorder %s903_s8, 0 }
  0x64   : > { %s1037_s13 = smov (!%p231_p7, %s230_s13), 0  ;;  %s226_s15 = scalar_lea.vmem [#allocation6], %s1035_s21 }
  0x65   : > { %v227_v2 = vld [vmem:[%s226_s15] sm:$0x1]  ;;  %s1039_s13 = smov (!%p479_p9, %s1037_s13), 127  ;;  %p484_p10 = scmp.lt.s32.totalorder %s903_s8, 127 }
  0x66   : > { %228 = vst [vmem:[%s905_s19 + $0x2] sm:$0x1] %v227_v2  ;;  %s241_s17 = scalar_select %p240_p11, %s903_s8, 0 }
  0x67   : > { %s235_s23 = scalar_lea.vmem [#allocation6], %s1039_s13  ;;  %s247_s20 = sadd.s32 5, %s889_s16 }
  0x68   : > { %v236_v3 = vld [vmem:[%s235_s23] sm:$0x1]  ;;  %s256_s24 = sadd.s32 6, %s889_s16  ;;  %s1041_s17 = smov (!%p484_p10, %s241_s17), 127 }
  0x69   : > { %237 = vst [vmem:[%s905_s19 + $0x3] sm:$0x1] %v236_v3  ;;  %s248_s26 = sld [smem:[#allocation4 + %s247_s20]]  ;;  %s265_s6 = sadd.s32 7, %s889_s16 }
  0x6a   : > { %s257_s0 = sld [smem:[#allocation4 + %s256_s24]]  ;;  %s244_s18 = scalar_lea.vmem [#allocation6], %s1041_s17 }
  0x6b   : > { %v245_v4 = vld [vmem:[%s244_s18] sm:$0x1]  ;;  %s266_s21 = sld [smem:[#allocation4 + %s265_s6]]  ;;  %p504_p0 = scmp.ne.s32.totalorder %s879_s14, 1 }
  0x6c   : > { %246 = vst [vmem:[%s905_s19 + $0x4] sm:$0x1] %v245_v4  ;;  %v751_v9 = vmov (!%p504_p0), 0   ;;  %v279_v10 = vld [vmem:[%s899_s25] sm:$0xff] (!%p504_p0)  ;;  %v280_v14 = vlaneseq (!%p504_p0)  ;;  %v301_v21 = vstv (!%p504_p0), %s889_s16  ;;  %v303_v23 = vstv (!%p504_p0), %s877_s9  ;;  %s307_s16 = sld [smem:[#allocation2]] (!%p504_p0) }
  0x6d   : > { %600 = vset.pattern.permute.xlu0 (!%p504_p0), %v751_v9  ;;  %v752_v28 = vmov (!%p504_p0), 0.0   ;;  %vm310_vm2 = vcmask (!%p504_p0), 7168  }
  0x6e   : > { %v281_v15 = vand.u32 (!%p504_p0), 127, %v280_v14  ;;  %v300_v20 = vshrl.u32 (!%p504_p0), %v280_v14, 7 }
  0x6f   : > { %p249_p12 = scmp.gt.s32.totalorder %s248_s26, 0  ;;  %p489_p1 = scmp.lt.s32.totalorder %s248_s26, 127 }
  0x70   : > { %p258_p2 = scmp.gt.s32.totalorder %s257_s0, 0  ;;  %p494_p6 = scmp.lt.s32.totalorder %s257_s0, 127  ;;  %v302_v22 = vadd.s32 (!%p504_p0), %v301_v21, %v300_v20 }
  0x71   : > { %s1043_s26 = smov (!%p249_p12, %s248_s26), 0  ;;  %p267_p8 = scmp.gt.s32.totalorder %s266_s21, 0 }
  0x72   : > { %s1045_s0 = smov (!%p258_p2, %s257_s0), 0  ;;  %s1047_s26 = smov (!%p489_p1, %s1043_s26), 127 }
  0x73   : > { %s1049_s0 = smov (!%p494_p6, %s1045_s0), 127  ;;  %s253_s8 = scalar_lea.vmem [#allocation6], %s1047_s26  ;;  %vm304_vm1 = vcmp.lt.s32.totalorder (!%p504_p0), %v302_v22, %v303_v23 }
  0x74   : > { %v254_v5 = vld [vmem:[%s253_s8] sm:$0x1]  ;;  %p499_p13 = scmp.lt.s32.totalorder %s266_s21, 127  ;;  %s262_s13 = scalar_lea.vmem [#allocation6], %s1049_s0  ;;  %v505_v29 = vsel (!%p504_p0), %vm304_vm1, 1.0, %v752_v28 }
  0x75   : > { %255 = vst [vmem:[%s905_s19 + $0x5] sm:$0x1] %v254_v5  ;;  %v263_v6 = vld [vmem:[%s262_s13] sm:$0x1]  ;;  %s1051_s21 = smov (!%p267_p8, %s266_s21), 0  ;;  %277 = sbr.rel (%p504_p0) target bundleno = 655 (0x28f), region = 40 }
  0x76   : > { %264 = vst [vmem:[%s905_s19 + $0x6] sm:$0x1] %v263_v6  ;;  %s1053_s21 = smov (!%p499_p13, %s1051_s21), 127 }
  0x77   : > { %s271_s22 = scalar_lea.vmem [#allocation6], %s1053_s21 }
  0x78   : > { %v272_v7 = vld [vmem:[%s271_s22] sm:$0x1] }
  0x79   : > { %273 = vst [vmem:[%s905_s19 + $0x7] sm:$0x1] %v272_v7 }
  0x80   : > { %v278_v8 = vld [vmem:[%s905_s19] sm:$0xff] }
  0x81   : > { %282 = vmax.xlane.f32.xlu0 %v278_v8 }
  0x97   : > { %293 = vperm.xlu0 %600, %v279_v10  }
 0x10e   : > { %v283_v11 = vpop.xlane.xlu0 %282 }
 0x10f   : > { %v284_v12 = vsub.f32 %v278_v8, %v283_v11 }
 0x111   : > { %v285_v13 = vmul.f32 1.442695, %v284_v12 }
 0x113   : > { %601 = vpow2.f32 %v285_v13 }
 0x116   : > { %v294_v16 = vpop.permute.xlu0 %293 }
 0x117   : > { %vm295_vm0 = vcmp.eq.s32.totalorder %v281_v15, %v294_v16 }
 0x118   : > { %v296_v18 = vsel %vm295_vm0, %v278_v8, 0.0 }
 0x11d   : > { %v602_v17 = vpop.eup %601 }
 0x11e   : > { %287 = vadd.xlane.f32.xlu1 %v602_v17 }
 0x122   : > { %297 = vadd.xlane.f32.xlu1 %v296_v18 }
 0x1ab   : > { %v288_v19 = vpop.xlane.xlu1 %287 }
 0x1ac   : > { %603 = vlog2.f32 %v288_v19 }
 0x1af   : > { %v298_v26 = vpop.xlane.xlu1 %297 }
 0x1b6   : > { %v604_v24 = vpop.eup %603 }
 0x1b7   : > { %v290_v25 = vmul.f32 0.6931472, %v604_v24 }
 0x1b9   : > { %v291_v27 = vadd.f32 %v290_v25, %v283_v11 }
 0x1bb   : > { %v308_v30 = vsub.f32 %v291_v27, %v298_v26 }
 0x1bd   : > { %v309_v31 = vmul.f32 %v505_v29, %v308_v30 }
 0x1bf   : > { %v311_v32 = vsel %vm310_vm2, %v309_v31, 0.0 }
 0x1c0   : > { %312 = vadd.xlane.f32.xlu1 %v311_v32 }
 0x24d   : > { %v313_v33 = vpop.xlane.xlu1 %312 }
 0x24e   : > { %v314_v34 = vrot.slane %v313_v33, 4 }
 0x250   : > { %v315_v35 = vadd.f32 %v314_v34, %v313_v33 }
 0x252   : > { %v316_v36 = vrot.slane %v315_v35, 2 }
 0x254   : > { %v317_v37 = vadd.f32 %v316_v36, %v315_v35 }
 0x256   : > { %v318_v38 = vrot.slane %v317_v37, 1 }
 0x258   : > { %v319_v39 = vadd.f32 %v318_v38, %v317_v37 }
 0x25a   : > { %528 = vpush %v319_v39 }
 0x28b   : > { %s529_s25 = spop %528 }
 0x28c   : > { %s321_s15 = sadd.f32 %s529_s25, %s307_s16 }
 0x28e   : > { %323 = sst [smem:[#allocation2]] %s321_s15 }
 0x28f PF: > { %p1014_p3 = scmp.eq.s32.totalorder %s812_s30, 1 }
 0x291   : > { %p325_p4 = pnand %p274_p5, %p1014_p3 }
 0x292   : > { %s330_s17 = scvt.s32.f32 (!%p325_p4), %s877_s9  ;;  %s329_s23 = sld [smem:[#allocation2]] (!%p325_p4) }
 0x293   : > { %328 = sbr.rel (%p325_p4) target bundleno = 725 (0x2d5), region = 44 }
 0x294   : > { %v331_v40 = vstv (!%p325_p4), %s330_s17 }
 0x295   : > { %605 = vrcp.f32 (!%p325_p4), %v331_v40 }
 0x29f   : > { %v606_v41 = vpop.eup %605 }
 0x2a0   : > { %530 = vpush %v606_v41 }
 0x2d1   : > { %s531_s20 = spop %530 }
 0x2d2   : > { %s334_s24 = smul.f32 %s531_s20, %s329_s23 }
 0x2d4   : > { %336 = sst [smem:[#allocation11]] %s334_s24 }
 0x2d5 PF: > { %s507_s26 = sshll.u32 %s812_s30, 7  ;;  %s351_s9 = sshll.u32 %s905_s19, 4  ;;  %s352_s9 = int_to_ptr.vmem [resolvable:$true] %s351_s9 }
 0x2d6   : > { %s935_s6 = scalar_lea.hbm %s997_s4, %s507_s26  ;;  %s1015_s18 = sand.u32 1, %s735_s27  }
 0x2d7   : > { %s338_s21 = scalar_lea.sflag [#allocation8], %s1015_s18  ;;  %s659_s8 = scalar_lea.vmem %s352_s9, 128 }
 0x2d8   : > { %p660_p5 = scmp.ne.s32.totalorder %s352_s9, %s659_s8  ;;  %p1016_p7 = scmp.ne.s32.totalorder %s1005_s11, 0 }
 0x2d9   : > { %s753_s13 = smov [#allocation10]  }
 0x2da   : > { %p661_p9 = pnand %p660_p5, %p1016_p7  ;;  %s663_s22 = sshll.u32 %s753_s13, 4  ;;  %s664_s22 = int_to_ptr.vmem [resolvable:$false] %s663_s22 }
 0x2db   : > { %s665_s16 = scalar_lea.vmem %s664_s22, 256  ;;  %p666_p10 = scmp.lt.s32.totalorder %s352_s9, %s664_s22 }
 0x2dc   : > { %p662_p11 = pneg %p661_p9  ;;  %p667_p12 = scmp.lt.s32.totalorder %s665_s16, %s659_s8 }
 0x2de   : > { %p668_p1 = por %p667_p12, %p666_p10 }
 0x2e0   : > { %p669_p2 = pnand %p668_p1, %p662_p11 }
 0x2e2   : > { %672 = shalt.err (!%p669_p2)
}
 0x2e3   : > { %s673_s19 = scalar_lea.hbm %s935_s6, 128  ;;  %s677_s17 = scalar_lea.hbm %s997_s4, 256 }
 0x2e4   : > { %p674_p6 = scmp.ne.s32.totalorder %s935_s6, %s673_s19  ;;  %p678_p0 = scmp.lt.u32.totalorder %s935_s6, %s997_s4 }
 0x2e5   : > { %p679_p3 = scmp.lt.u32.totalorder %s677_s17, %s673_s19  ;;  %p681_p5 = scmp.lt.u32.totalorder %s673_s19, %s935_s6 }
 0x2e6   : > { %p675_p8 = pnand %p674_p6, %p1016_p7 }
 0x2e7   : > { %p680_p4 = por %p679_p3, %p678_p0 }
 0x2e8   : > { %p676_p13 = pneg %p675_p8 }
 0x2e9   : > { %p682_p9 = por %p681_p5, %p680_p4 }
 0x2eb   : > { %p683_p11 = pnand %p682_p9, %p676_p13 }
 0x2ed   : > { %686 = shalt.err (!%p683_p11)
}
 0x2ee   : > { %539 = dma.vmem_to_hbm [thread:$0]  (%p1016_p7), %s352_s9, 128, %s935_s6, %s338_s21  }
 0x2ef   : > { %s687_s0 = scalar_lea.hbm %s998_s5, 16  ;;  %p1017_p12 = scmp.eq.s32.totalorder %s812_s30, 1 }
 0x2f0   : > { %p688_p10 = scmp.ne.s32.totalorder %s998_s5, %s687_s0  ;;  %p693_p6 = scmp.lt.u32.totalorder %s687_s0, %s998_s5 }
 0x2f2   : > { %p689_p1 = pnand %p688_p10, %p1017_p12 }
 0x2f4   : > { %p690_p2 = pneg %p689_p1 }
 0x2f6   : > { %p695_p8 = pnand %p693_p6, %p690_p2 }
 0x2f8   : > { %698 = shalt.err (!%p695_p8)
}
 0x2f9   : > { %s754_s11 = smov [#allocation11]   ;;  %p1018_p7 = pmov %p1017_p12 }
 0x2fb   : > { %541 = dma.smem_to_hbm (%p1018_p7), %s754_s11, 16, %s998_s5, [#allocation9]  }
 0x2fc   : > { %p1019_p13 = pmov %p1018_p7 }
 0x2fd   : > { %p1020_p0 = pmov %p1018_p7 }
 0x2fe   : > { %722 = dma.done.wait (%p1019_p13), [#allocation9], 16  }
 0x2ff   : > { %724 = vsyncadd (%p1020_p0), [#allocation9], 4294967280 }
 0x300   : > { %368 = sfence }
 0x301 PF: > { %p558_p3 = scmp.ge.s32.totalorder %s743_s29, 2  ;;  %s377_s21 = sand.u32 1, %s731_s1  }
 0x302   : > { %p1021_p4 = scmp.ne.s32.totalorder %s1006_s12, 0  ;;  %s378_s22 = scalar_lea.sflag [#allocation8], %s377_s21 }
 0x304   : > { %p550_p5 = pnand %p558_p3, %p1021_p4 }
 0x306   : > { %726 = dma.done.wait (!%p550_p5), %s378_s22, 128  }
 0x307   : > { %728 = vsyncadd (!%p550_p5), %s378_s22, 4294967168  ;;  %p28_p9 = scmp.ge.s32.totalorder %s816_s7, 4   ;;  %s1022_s1 = smov %s735_s27 }
 0x308   : > { %s1023_s27 = smov %s739_s28  ;;  %s1024_s28 = smov %s827_s10 }
 0x309   : > { %s1025_s29 = smov %s816_s7  ;;  %30 = sbr.rel (!%p28_p9) target bundleno = 30 (0x1e), region = 101 }
 0x310   :  { %383 = vsyncpa [#allocation7], 1 }
 0x311   :  { %385 = vsyncpa [#allocation7 + $0x1], 1 }
 0x312   :  { %386 = vsyncpa [#allocation8], 1 }
 0x313   :  { %388 = vsyncpa [#allocation8 + $0x1], 1 }
 0x314   :  { %389 = vsyncpa [#allocation9], 1 }
 0x315   :  { %391 = vsyncpa [#allocation9 + $0x1], 1 }

</bundles_post_ra>
